<compile_context>
chip_gen: v5e
topology: v5e:2x2
jax: 0.10.0
libtpu: 0.0.40
codegen_flags: <defaults>
</compile_context>

<pallas_src>
import math
import functools

import jax
import jax.numpy as jnp
from jax import lax
from jax.experimental import pallas as pl
from jax.experimental.pallas import tpu as pltpu

# ---------------- config (small, consistent with the module) ----------------
B = 2          # batch
T = 8          # sequence length
C = 32         # n_embd
H = 4          # n_head
HD = C // H    # head dim
LN_EPS = 1e-5


def _layernorm(x, g, b):
    mean = jnp.mean(x, axis=-1, keepdims=True)
    xc = x - mean
    var = jnp.mean(xc * xc, axis=-1, keepdims=True)
    return xc * lax.rsqrt(var + LN_EPS) * g + b


def _gelu_tanh(x):
    # GELU(approximate='tanh')
    c = math.sqrt(2.0 / math.pi)
    return 0.5 * x * (1.0 + jnp.tanh(c * (x + 0.044715 * x * x * x)))


def block_kernel(x_ref,
                 ln1g_ref, ln1b_ref, ln2g_ref, ln2b_ref,
                 wattn_ref, battn_ref, waproj_ref, baproj_ref,
                 wfc_ref, bfc_ref, wmproj_ref, bmproj_ref,
                 out_ref, yheads_ref, *, seq, n_embd, n_head):
    head_dim = n_embd // n_head
    bf16 = jnp.bfloat16

    x = x_ref[...]                                           # (T, C) f32

    # ---------------- attention branch ----------------
    y1 = _layernorm(x, ln1g_ref[...], ln1b_ref[...])         # f32 elementwise
    qkv = jnp.dot(y1.astype(bf16), wattn_ref[...].astype(bf16),
                  preferred_element_type=jnp.float32) + battn_ref[...]   # (T, 3C) f32

    # Causal mask as an additive bias, built once (hoisted out of head loop).
    row = lax.broadcasted_iota(jnp.int32, (seq, seq), 0)
    col = lax.broadcasted_iota(jnp.int32, (seq, seq), 1)
    mask_bias = jnp.where(row >= col, jnp.float32(0.0), jnp.float32(-1e30))

    scale = 1.0 / math.sqrt(head_dim)
    q_all = (qkv[:, :n_embd] * scale).astype(bf16)           # scale folded into q once
    k_all = qkv[:, n_embd:2 * n_embd].astype(bf16)
    v_all = qkv[:, 2 * n_embd:].astype(bf16)

    for h in range(n_head):                                  # tiny static head loop
        lo = h * head_dim
        hi = lo + head_dim
        qh = q_all[:, lo:hi]                                 # (T, HD) bf16
        kh = k_all[:, lo:hi]
        vh = v_all[:, lo:hi]
        s = jnp.einsum('nd,md->nm', qh, kh,
                       preferred_element_type=jnp.float32) + mask_bias    # (T, T) f32
        s = s - jnp.max(s, axis=-1, keepdims=True)
        p = jnp.exp(s)
        p = p / jnp.sum(p, axis=-1, keepdims=True)           # exact normalization
        # write this head's output into its lane slice of the (T, C) scratch
        yheads_ref[:, lo:hi] = jnp.dot(p.astype(bf16), vh,
                                       preferred_element_type=jnp.float32)

    # single (T,C)@(C,C) output projection over all heads
    attn = jnp.dot(yheads_ref[...].astype(bf16), waproj_ref[...].astype(bf16),
                   preferred_element_type=jnp.float32) + baproj_ref[...]

    x1 = x + attn                                            # residual 1

    # ---------------- MLP branch ----------------
    y2 = _layernorm(x1, ln2g_ref[...], ln2b_ref[...])
    hdn = jnp.dot(y2.astype(bf16), wfc_ref[...].astype(bf16),
                  preferred_element_type=jnp.float32) + bfc_ref[...]      # (T, 4C)
    hdn = _gelu_tanh(hdn)                                    # f32 elementwise
    mlp = jnp.dot(hdn.astype(bf16), wmproj_ref[...].astype(bf16),
                  preferred_element_type=jnp.float32) + bmproj_ref[...]   # (T, C)

    out_ref[...] = x1 + mlp                                  # residual 2


def block_forward(x, params):
    (ln1_g, ln1_b, w_attn, b_attn, w_aproj, b_aproj,
     ln2_g, ln2_b, w_fc, b_fc, w_mproj, b_mproj) = params
    b, t, c = x.shape
    n = b * t

    x2 = x.reshape(n, c)                                     # (B*T, C)

    def r2(v):                                               # 1-D vector -> (1, X) row
        return v.reshape(1, -1)

    kern = functools.partial(block_kernel, seq=t, n_embd=c, n_head=H)

    # x / out are tiled per batch element; everything else is loaded once and
    # stays resident (constant index_map -> no re-DMA across grid steps).
    per_batch = pl.BlockSpec((t, c), lambda i: (i, 0))
    resident = lambda shape: pl.BlockSpec(shape, lambda i: (0, 0))

    out2 = pl.pallas_call(
        kern,
        out_shape=jax.ShapeDtypeStruct((n, c), jnp.float32),
        grid=(b,),
        in_specs=[
            per_batch,                       # x
            resident((1, c)),                # ln1_g
            resident((1, c)),                # ln1_b
            resident((1, c)),                # ln2_g
            resident((1, c)),                # ln2_b
            resident((c, 3 * c)),            # w_attn
            resident((1, 3 * c)),            # b_attn
            resident((c, c)),                # w_aproj
            resident((1, c)),                # b_aproj
            resident((c, 4 * c)),            # w_fc
            resident((1, 4 * c)),            # b_fc
            resident((4 * c, c)),            # w_mproj
            resident((1, c)),                # b_mproj
        ],
        out_specs=per_batch,
        scratch_shapes=[pltpu.VMEM((t, c), jnp.float32)],    # per-head output slab
        compiler_params=pltpu.CompilerParams(
            dimension_semantics=("parallel",),               # batch shards across TCs (v7x)
            vmem_limit_bytes=32 * 1024 * 1024,               # re-derive per gen at prod shapes
        ),
    )(x2,
      r2(ln1_g), r2(ln1_b), r2(ln2_g), r2(ln2_b),
      w_attn, r2(b_attn), w_aproj, r2(b_aproj),
      w_fc, r2(b_fc), w_mproj, r2(b_mproj))
    return out2.reshape(b, t, c)


# ---------------- pure-JAX reference for verification ----------------
def block_reference(x, params):
    (ln1_g, ln1_b, w_attn, b_attn, w_aproj, b_aproj,
     ln2_g, ln2_b, w_fc, b_fc, w_mproj, b_mproj) = params
    b, t, c = x.shape
    hd = c // H

    def ln(v, g, bb):
        m = jnp.mean(v, axis=-1, keepdims=True)
        s = jnp.mean((v - m) ** 2, axis=-1, keepdims=True)
        return (v - m) * lax.rsqrt(s + LN_EPS) * g + bb

    y1 = ln(x, ln1_g, ln1_b)
    qkv = y1 @ w_attn + b_attn
    q, k, v = jnp.split(qkv, 3, axis=-1)
    q = q.reshape(b, t, H, hd).transpose(0, 2, 1, 3)
    k = k.reshape(b, t, H, hd).transpose(0, 2, 1, 3)
    v = v.reshape(b, t, H, hd).transpose(0, 2, 1, 3)
    s = jnp.einsum('bhtd,bhsd->bhts', q, k) / math.sqrt(hd)
    mask = jnp.tril(jnp.ones((t, t), dtype=bool))
    s = jnp.where(mask, s, -jnp.inf)
    p = jax.nn.softmax(s, axis=-1)
    y = jnp.einsum('bhts,bhsd->bhtd', p, v).transpose(0, 2, 1, 3).reshape(b, t, c)
    x1 = x + (y @ w_aproj + b_aproj)

    y2 = ln(x1, ln2_g, ln2_b)
    hdn = y2 @ w_fc + b_fc
    cst = math.sqrt(2.0 / math.pi)
    hdn = 0.5 * hdn * (1.0 + jnp.tanh(cst * (hdn + 0.044715 * hdn ** 3)))
    return x1 + (hdn @ w_mproj + b_mproj)


if __name__ == "__main__":
    key = jax.random.PRNGKey(0)
    keys = jax.random.split(key, 8)

    x = jax.random.normal(keys[0], (B, T, C), dtype=jnp.float32)

    # deterministic parameter init (gamma=1, beta=0 for LayerNorm; small normals for Linears)
    ln1_g = jnp.ones((C,), jnp.float32)
    ln1_b = jnp.zeros((C,), jnp.float32)
    ln2_g = jnp.ones((C,), jnp.float32)
    ln2_b = jnp.zeros((C,), jnp.float32)

    w_attn  = 0.02 * jax.random.normal(keys[1], (C, 3 * C), jnp.float32)
    b_attn  = 0.01 * jax.random.normal(keys[2], (3 * C,), jnp.float32)
    w_aproj = 0.02 * jax.random.normal(keys[3], (C, C), jnp.float32)
    b_aproj = 0.01 * jax.random.normal(keys[4], (C,), jnp.float32)
    w_fc    = 0.02 * jax.random.normal(keys[5], (C, 4 * C), jnp.float32)
    b_fc    = 0.01 * jax.random.normal(keys[6], (4 * C,), jnp.float32)
    w_mproj = 0.02 * jax.random.normal(keys[7], (4 * C, C), jnp.float32)
    b_mproj = jnp.zeros((C,), jnp.float32)

    params = (ln1_g, ln1_b, w_attn, b_attn, w_aproj, b_aproj,
              ln2_g, ln2_b, w_fc, b_fc, w_mproj, b_mproj)

    out = jax.block_until_ready(block_forward(x, params))
    ref = block_reference(x, params)

    assert out.shape == (B, T, C)
    max_err = jnp.max(jnp.abs(out - ref))
    # tolerance covers bf16 MXU operands (f32 accumulation, f32 elementwise math)
    assert jnp.allclose(out, ref, atol=2e-2, rtol=2e-2), \
        f"mismatch: max abs err {max_err}"

    print("KERNEL_OK")
</pallas_src>

<mosaic_0001>
module attributes {stable_mosaic.version = 11 : i64} {
  func.func @block_kernel(%arg0: i32, %arg1: memref<8x32xf32, #tpu.memory_space<vmem>>, %arg2: memref<1x32xf32, #tpu.memory_space<vmem>>, %arg3: memref<1x32xf32, #tpu.memory_space<vmem>>, %arg4: memref<1x32xf32, #tpu.memory_space<vmem>>, %arg5: memref<1x32xf32, #tpu.memory_space<vmem>>, %arg6: memref<32x96xf32, #tpu.memory_space<vmem>>, %arg7: memref<1x96xf32, #tpu.memory_space<vmem>>, %arg8: memref<32x32xf32, #tpu.memory_space<vmem>>, %arg9: memref<1x32xf32, #tpu.memory_space<vmem>>, %arg10: memref<32x128xf32, #tpu.memory_space<vmem>>, %arg11: memref<1x128xf32, #tpu.memory_space<vmem>>, %arg12: memref<128x32xf32, #tpu.memory_space<vmem>>, %arg13: memref<1x32xf32, #tpu.memory_space<vmem>>, %arg14: memref<8x32xf32, #tpu.memory_space<vmem>>, %arg15: memref<8x32xf32, #tpu.memory_space<vmem>>) attributes {dimension_semantics = [#tpu.dimension_semantics<parallel>], iteration_bounds = array<i64: 2>, scalar_prefetch = 0 : i64, scratch_operands = 1 : i64, tpu.core_type = #tpu.core_type<tc>, window_params = [{transform_indices = @transform_0, window_bounds = array<i64: 8, 32>}, {pipeline_mode = #tpu.pipeline_mode<synchronous>, transform_indices = @transform_1, window_bounds = array<i64: 1, 32>}, {pipeline_mode = #tpu.pipeline_mode<synchronous>, transform_indices = @transform_2, window_bounds = array<i64: 1, 32>}, {pipeline_mode = #tpu.pipeline_mode<synchronous>, transform_indices = @transform_3, window_bounds = array<i64: 1, 32>}, {pipeline_mode = #tpu.pipeline_mode<synchronous>, transform_indices = @transform_4, window_bounds = array<i64: 1, 32>}, {pipeline_mode = #tpu.pipeline_mode<synchronous>, transform_indices = @transform_5, window_bounds = array<i64: 32, 96>}, {pipeline_mode = #tpu.pipeline_mode<synchronous>, transform_indices = @transform_6, window_bounds = array<i64: 1, 96>}, {pipeline_mode = #tpu.pipeline_mode<synchronous>, transform_indices = @transform_7, window_bounds = array<i64: 32, 32>}, {pipeline_mode = #tpu.pipeline_mode<synchronous>, transform_indices = @transform_8, window_bounds = array<i64: 1, 32>}, {pipeline_mode = #tpu.pipeline_mode<synchronous>, transform_indices = @transform_9, window_bounds = array<i64: 32, 128>}, {pipeline_mode = #tpu.pipeline_mode<synchronous>, transform_indices = @transform_10, window_bounds = array<i64: 1, 128>}, {pipeline_mode = #tpu.pipeline_mode<synchronous>, transform_indices = @transform_11, window_bounds = array<i64: 128, 32>}, {pipeline_mode = #tpu.pipeline_mode<synchronous>, transform_indices = @transform_12, window_bounds = array<i64: 1, 32>}, {transform_indices = @transform_13, window_bounds = array<i64: 8, 32>}]} {
    %c0 = arith.constant 0 : index
    %c0_0 = arith.constant 0 : index
    %0 = vector.load %arg1[%c0, %c0_0] : memref<8x32xf32, #tpu.memory_space<vmem>>, vector<8x32xf32>
    %c0_1 = arith.constant 0 : index
    %c0_2 = arith.constant 0 : index
    %1 = vector.load %arg2[%c0_1, %c0_2] : memref<1x32xf32, #tpu.memory_space<vmem>>, vector<1x32xf32>
    %c0_3 = arith.constant 0 : index
    %c0_4 = arith.constant 0 : index
    %2 = vector.load %arg3[%c0_3, %c0_4] : memref<1x32xf32, #tpu.memory_space<vmem>>, vector<1x32xf32>
    %cst = arith.constant dense<0.000000e+00> : vector<8xf32>
    %3 = vector.multi_reduction <add>, %0, %cst [1] : vector<8x32xf32> to vector<8xf32>
    %4 = vector.shape_cast %3 : vector<8xf32> to vector<8x1xf32>
    %cst_5 = arith.constant 3.200000e+01 : f32
    %5 = vector.broadcast %cst_5 : f32 to vector<8x1xf32>
    %6 = arith.divf %4, %5 : vector<8x1xf32>
    %7 = vector.broadcast %6 : vector<8x1xf32> to vector<8x32xf32>
    %8 = arith.subf %0, %7 : vector<8x32xf32>
    %9 = arith.mulf %8, %8 : vector<8x32xf32>
    %cst_6 = arith.constant dense<0.000000e+00> : vector<8xf32>
    %10 = vector.multi_reduction <add>, %9, %cst_6 [1] : vector<8x32xf32> to vector<8xf32>
    %11 = vector.shape_cast %10 : vector<8xf32> to vector<8x1xf32>
    %cst_7 = arith.constant 3.200000e+01 : f32
    %12 = vector.broadcast %cst_7 : f32 to vector<8x1xf32>
    %13 = arith.divf %11, %12 : vector<8x1xf32>
    %cst_8 = arith.constant 9.99999974E-6 : f32
    %14 = vector.broadcast %cst_8 : f32 to vector<8x1xf32>
    %15 = arith.addf %13, %14 : vector<8x1xf32>
    %16 = math.rsqrt %15 : vector<8x1xf32>
    %17 = vector.broadcast %16 : vector<8x1xf32> to vector<8x32xf32>
    %18 = arith.mulf %8, %17 : vector<8x32xf32>
    %19 = vector.broadcast %1 : vector<1x32xf32> to vector<8x32xf32>
    %20 = arith.mulf %18, %19 : vector<8x32xf32>
    %21 = vector.broadcast %2 : vector<1x32xf32> to vector<8x32xf32>
    %22 = arith.addf %20, %21 : vector<8x32xf32>
    %23 = arith.truncf %22 : vector<8x32xf32> to vector<8x32xbf16>
    %c0_9 = arith.constant 0 : index
    %c0_10 = arith.constant 0 : index
    %24 = vector.load %arg6[%c0_9, %c0_10] : memref<32x96xf32, #tpu.memory_space<vmem>>, vector<32x96xf32>
    %25 = arith.truncf %24 : vector<32x96xf32> to vector<32x96xbf16>
    %cst_11 = arith.constant dense<0.000000e+00> : vector<8x96xf32>
    %26 = tpu.matmul %23, %25, %cst_11 {dimension_numbers = #tpu.dot_dimension_numbers<[1], [0], [0], [1], [0, 0, 1, 1], [], []>} : vector<8x32xbf16>, vector<32x96xbf16>, vector<8x96xf32> -> vector<8x96xf32>
    %c0_12 = arith.constant 0 : index
    %c0_13 = arith.constant 0 : index
    %27 = vector.load %arg7[%c0_12, %c0_13] : memref<1x96xf32, #tpu.memory_space<vmem>>, vector<1x96xf32>
    %28 = vector.broadcast %27 : vector<1x96xf32> to vector<8x96xf32>
    %29 = arith.addf %26, %28 : vector<8x96xf32>
    %30 = tpu.iota {dimensions = array<i32: 0>} : vector<8x8xi32>
    %31 = tpu.iota {dimensions = array<i32: 1>} : vector<8x8xi32>
    %32 = arith.cmpi sge, %30, %31 : vector<8x8xi32>
    %cst_14 = arith.constant 0.000000e+00 : f32
    %cst_15 = arith.constant -1.000000e+30 : f32
    %33 = vector.broadcast %cst_14 : f32 to vector<8x8xf32>
    %34 = vector.broadcast %cst_15 : f32 to vector<8x8xf32>
    %35 = arith.select %32, %33, %34 : vector<8x8xi1>, vector<8x8xf32>
    %36 = vector.extract_strided_slice %29 {offsets = [0, 0], sizes = [8, 32], strides = [1, 1]} : vector<8x96xf32> to vector<8x32xf32>
    %cst_16 = arith.constant 0.353553385 : f32
    %37 = vector.broadcast %cst_16 : f32 to vector<8x32xf32>
    %38 = arith.mulf %36, %37 : vector<8x32xf32>
    %39 = arith.truncf %38 : vector<8x32xf32> to vector<8x32xbf16>
    %40 = vector.extract_strided_slice %29 {offsets = [0, 32], sizes = [8, 32], strides = [1, 1]} : vector<8x96xf32> to vector<8x32xf32>
    %41 = arith.truncf %40 : vector<8x32xf32> to vector<8x32xbf16>
    %42 = vector.extract_strided_slice %29 {offsets = [0, 64], sizes = [8, 32], strides = [1, 1]} : vector<8x96xf32> to vector<8x32xf32>
    %43 = arith.truncf %42 : vector<8x32xf32> to vector<8x32xbf16>
    %44 = vector.extract_strided_slice %39 {offsets = [0, 0], sizes = [8, 8], strides = [1, 1]} : vector<8x32xbf16> to vector<8x8xbf16>
    %45 = vector.extract_strided_slice %41 {offsets = [0, 0], sizes = [8, 8], strides = [1, 1]} : vector<8x32xbf16> to vector<8x8xbf16>
    %46 = vector.extract_strided_slice %43 {offsets = [0, 0], sizes = [8, 8], strides = [1, 1]} : vector<8x32xbf16> to vector<8x8xbf16>
    "tpu.trace_start"() <{level = 10 : i32, message = "nd,md->nm"}> : () -> ()
    %cst_17 = arith.constant dense<0.000000e+00> : vector<8x8xf32>
    %47 = tpu.matmul %44, %45, %cst_17 {dimension_numbers = #tpu.dot_dimension_numbers<[1], [1], [0], [0], [0, 0, 1, 0], [], []>} : vector<8x8xbf16>, vector<8x8xbf16>, vector<8x8xf32> -> vector<8x8xf32>
    "tpu.trace_stop"() : () -> ()
    %48 = arith.addf %47, %35 : vector<8x8xf32>
    %cst_18 = arith.constant dense<0xFF800000> : vector<8xf32>
    %49 = vector.multi_reduction <maximumf>, %48, %cst_18 [1] : vector<8x8xf32> to vector<8xf32>
    %50 = vector.shape_cast %49 : vector<8xf32> to vector<8x1xf32>
    %51 = vector.broadcast %50 : vector<8x1xf32> to vector<8x8xf32>
    %52 = arith.subf %48, %51 : vector<8x8xf32>
    %53 = math.exp %52 : vector<8x8xf32>
    %cst_19 = arith.constant dense<0.000000e+00> : vector<8xf32>
    %54 = vector.multi_reduction <add>, %53, %cst_19 [1] : vector<8x8xf32> to vector<8xf32>
    %55 = vector.shape_cast %54 : vector<8xf32> to vector<8x1xf32>
    %56 = vector.broadcast %55 : vector<8x1xf32> to vector<8x8xf32>
    %57 = arith.divf %53, %56 : vector<8x8xf32>
    %58 = arith.truncf %57 : vector<8x8xf32> to vector<8x8xbf16>
    %cst_20 = arith.constant dense<0.000000e+00> : vector<8x8xf32>
    %59 = tpu.matmul %58, %46, %cst_20 {dimension_numbers = #tpu.dot_dimension_numbers<[1], [0], [0], [1], [0, 0, 1, 1], [], []>} : vector<8x8xbf16>, vector<8x8xbf16>, vector<8x8xf32> -> vector<8x8xf32>
    %c0_21 = arith.constant 0 : index
    %c0_22 = arith.constant 0 : index
    %60 = vector.load %arg15[%c0_21, %c0_22] : memref<8x32xf32, #tpu.memory_space<vmem>>, vector<8x8xf32>
    tpu.vector_store %arg15[%c0_21, %c0_22], %59 {strides = array<i32>} : memref<8x32xf32, #tpu.memory_space<vmem>>, vector<8x8xf32>,
    %61 = vector.extract_strided_slice %39 {offsets = [0, 8], sizes = [8, 8], strides = [1, 1]} : vector<8x32xbf16> to vector<8x8xbf16>
    %62 = vector.extract_strided_slice %41 {offsets = [0, 8], sizes = [8, 8], strides = [1, 1]} : vector<8x32xbf16> to vector<8x8xbf16>
    %63 = vector.extract_strided_slice %43 {offsets = [0, 8], sizes = [8, 8], strides = [1, 1]} : vector<8x32xbf16> to vector<8x8xbf16>
    "tpu.trace_start"() <{level = 10 : i32, message = "nd,md->nm"}> : () -> ()
    %cst_23 = arith.constant dense<0.000000e+00> : vector<8x8xf32>
    %64 = tpu.matmul %61, %62, %cst_23 {dimension_numbers = #tpu.dot_dimension_numbers<[1], [1], [0], [0], [0, 0, 1, 0], [], []>} : vector<8x8xbf16>, vector<8x8xbf16>, vector<8x8xf32> -> vector<8x8xf32>
    "tpu.trace_stop"() : () -> ()
    %65 = arith.addf %64, %35 : vector<8x8xf32>
    %cst_24 = arith.constant dense<0xFF800000> : vector<8xf32>
    %66 = vector.multi_reduction <maximumf>, %65, %cst_24 [1] : vector<8x8xf32> to vector<8xf32>
    %67 = vector.shape_cast %66 : vector<8xf32> to vector<8x1xf32>
    %68 = vector.broadcast %67 : vector<8x1xf32> to vector<8x8xf32>
    %69 = arith.subf %65, %68 : vector<8x8xf32>
    %70 = math.exp %69 : vector<8x8xf32>
    %cst_25 = arith.constant dense<0.000000e+00> : vector<8xf32>
    %71 = vector.multi_reduction <add>, %70, %cst_25 [1] : vector<8x8xf32> to vector<8xf32>
    %72 = vector.shape_cast %71 : vector<8xf32> to vector<8x1xf32>
    %73 = vector.broadcast %72 : vector<8x1xf32> to vector<8x8xf32>
    %74 = arith.divf %70, %73 : vector<8x8xf32>
    %75 = arith.truncf %74 : vector<8x8xf32> to vector<8x8xbf16>
    %cst_26 = arith.constant dense<0.000000e+00> : vector<8x8xf32>
    %76 = tpu.matmul %75, %63, %cst_26 {dimension_numbers = #tpu.dot_dimension_numbers<[1], [0], [0], [1], [0, 0, 1, 1], [], []>} : vector<8x8xbf16>, vector<8x8xbf16>, vector<8x8xf32> -> vector<8x8xf32>
    %c0_27 = arith.constant 0 : index
    %c8 = arith.constant 8 : index
    %77 = vector.load %arg15[%c0_27, %c8] : memref<8x32xf32, #tpu.memory_space<vmem>>, vector<8x8xf32>
    tpu.vector_store %arg15[%c0_27, %c8], %76 {strides = array<i32>} : memref<8x32xf32, #tpu.memory_space<vmem>>, vector<8x8xf32>,
    %78 = vector.extract_strided_slice %39 {offsets = [0, 16], sizes = [8, 8], strides = [1, 1]} : vector<8x32xbf16> to vector<8x8xbf16>
    %79 = vector.extract_strided_slice %41 {offsets = [0, 16], sizes = [8, 8], strides = [1, 1]} : vector<8x32xbf16> to vector<8x8xbf16>
    %80 = vector.extract_strided_slice %43 {offsets = [0, 16], sizes = [8, 8], strides = [1, 1]} : vector<8x32xbf16> to vector<8x8xbf16>
    "tpu.trace_start"() <{level = 10 : i32, message = "nd,md->nm"}> : () -> ()
    %cst_28 = arith.constant dense<0.000000e+00> : vector<8x8xf32>
    %81 = tpu.matmul %78, %79, %cst_28 {dimension_numbers = #tpu.dot_dimension_numbers<[1], [1], [0], [0], [0, 0, 1, 0], [], []>} : vector<8x8xbf16>, vector<8x8xbf16>, vector<8x8xf32> -> vector<8x8xf32>
    "tpu.trace_stop"() : () -> ()
    %82 = arith.addf %81, %35 : vector<8x8xf32>
    %cst_29 = arith.constant dense<0xFF800000> : vector<8xf32>
    %83 = vector.multi_reduction <maximumf>, %82, %cst_29 [1] : vector<8x8xf32> to vector<8xf32>
    %84 = vector.shape_cast %83 : vector<8xf32> to vector<8x1xf32>
    %85 = vector.broadcast %84 : vector<8x1xf32> to vector<8x8xf32>
    %86 = arith.subf %82, %85 : vector<8x8xf32>
    %87 = math.exp %86 : vector<8x8xf32>
    %cst_30 = arith.constant dense<0.000000e+00> : vector<8xf32>
    %88 = vector.multi_reduction <add>, %87, %cst_30 [1] : vector<8x8xf32> to vector<8xf32>
    %89 = vector.shape_cast %88 : vector<8xf32> to vector<8x1xf32>
    %90 = vector.broadcast %89 : vector<8x1xf32> to vector<8x8xf32>
    %91 = arith.divf %87, %90 : vector<8x8xf32>
    %92 = arith.truncf %91 : vector<8x8xf32> to vector<8x8xbf16>
    %cst_31 = arith.constant dense<0.000000e+00> : vector<8x8xf32>
    %93 = tpu.matmul %92, %80, %cst_31 {dimension_numbers = #tpu.dot_dimension_numbers<[1], [0], [0], [1], [0, 0, 1, 1], [], []>} : vector<8x8xbf16>, vector<8x8xbf16>, vector<8x8xf32> -> vector<8x8xf32>
    %c0_32 = arith.constant 0 : index
    %c16 = arith.constant 16 : index
    %94 = vector.load %arg15[%c0_32, %c16] : memref<8x32xf32, #tpu.memory_space<vmem>>, vector<8x8xf32>
    tpu.vector_store %arg15[%c0_32, %c16], %93 {strides = array<i32>} : memref<8x32xf32, #tpu.memory_space<vmem>>, vector<8x8xf32>,
    %95 = vector.extract_strided_slice %39 {offsets = [0, 24], sizes = [8, 8], strides = [1, 1]} : vector<8x32xbf16> to vector<8x8xbf16>
    %96 = vector.extract_strided_slice %41 {offsets = [0, 24], sizes = [8, 8], strides = [1, 1]} : vector<8x32xbf16> to vector<8x8xbf16>
    %97 = vector.extract_strided_slice %43 {offsets = [0, 24], sizes = [8, 8], strides = [1, 1]} : vector<8x32xbf16> to vector<8x8xbf16>
    "tpu.trace_start"() <{level = 10 : i32, message = "nd,md->nm"}> : () -> ()
    %cst_33 = arith.constant dense<0.000000e+00> : vector<8x8xf32>
    %98 = tpu.matmul %95, %96, %cst_33 {dimension_numbers = #tpu.dot_dimension_numbers<[1], [1], [0], [0], [0, 0, 1, 0], [], []>} : vector<8x8xbf16>, vector<8x8xbf16>, vector<8x8xf32> -> vector<8x8xf32>
    "tpu.trace_stop"() : () -> ()
    %99 = arith.addf %98, %35 : vector<8x8xf32>
    %cst_34 = arith.constant dense<0xFF800000> : vector<8xf32>
    %100 = vector.multi_reduction <maximumf>, %99, %cst_34 [1] : vector<8x8xf32> to vector<8xf32>
    %101 = vector.shape_cast %100 : vector<8xf32> to vector<8x1xf32>
    %102 = vector.broadcast %101 : vector<8x1xf32> to vector<8x8xf32>
    %103 = arith.subf %99, %102 : vector<8x8xf32>
    %104 = math.exp %103 : vector<8x8xf32>
    %cst_35 = arith.constant dense<0.000000e+00> : vector<8xf32>
    %105 = vector.multi_reduction <add>, %104, %cst_35 [1] : vector<8x8xf32> to vector<8xf32>
    %106 = vector.shape_cast %105 : vector<8xf32> to vector<8x1xf32>
    %107 = vector.broadcast %106 : vector<8x1xf32> to vector<8x8xf32>
    %108 = arith.divf %104, %107 : vector<8x8xf32>
    %109 = arith.truncf %108 : vector<8x8xf32> to vector<8x8xbf16>
    %cst_36 = arith.constant dense<0.000000e+00> : vector<8x8xf32>
    %110 = tpu.matmul %109, %97, %cst_36 {dimension_numbers = #tpu.dot_dimension_numbers<[1], [0], [0], [1], [0, 0, 1, 1], [], []>} : vector<8x8xbf16>, vector<8x8xbf16>, vector<8x8xf32> -> vector<8x8xf32>
    %c0_37 = arith.constant 0 : index
    %c24 = arith.constant 24 : index
    %111 = vector.load %arg15[%c0_37, %c24] : memref<8x32xf32, #tpu.memory_space<vmem>>, vector<8x8xf32>
    tpu.vector_store %arg15[%c0_37, %c24], %110 {strides = array<i32>} : memref<8x32xf32, #tpu.memory_space<vmem>>, vector<8x8xf32>,
    %c0_38 = arith.constant 0 : index
    %c0_39 = arith.constant 0 : index
    %112 = vector.load %arg15[%c0_38, %c0_39] : memref<8x32xf32, #tpu.memory_space<vmem>>, vector<8x32xf32>
    %113 = arith.truncf %112 : vector<8x32xf32> to vector<8x32xbf16>
    %c0_40 = arith.constant 0 : index
    %c0_41 = arith.constant 0 : index
    %114 = vector.load %arg8[%c0_40, %c0_41] : memref<32x32xf32, #tpu.memory_space<vmem>>, vector<32x32xf32>
    %115 = arith.truncf %114 : vector<32x32xf32> to vector<32x32xbf16>
    %cst_42 = arith.constant dense<0.000000e+00> : vector<8x32xf32>
    %116 = tpu.matmul %113, %115, %cst_42 {dimension_numbers = #tpu.dot_dimension_numbers<[1], [0], [0], [1], [0, 0, 1, 1], [], []>} : vector<8x32xbf16>, vector<32x32xbf16>, vector<8x32xf32> -> vector<8x32xf32>
    %c0_43 = arith.constant 0 : index
    %c0_44 = arith.constant 0 : index
    %117 = vector.load %arg9[%c0_43, %c0_44] : memref<1x32xf32, #tpu.memory_space<vmem>>, vector<1x32xf32>
    %118 = vector.broadcast %117 : vector<1x32xf32> to vector<8x32xf32>
    %119 = arith.addf %116, %118 : vector<8x32xf32>
    %120 = arith.addf %0, %119 : vector<8x32xf32>
    %c0_45 = arith.constant 0 : index
    %c0_46 = arith.constant 0 : index
    %121 = vector.load %arg4[%c0_45, %c0_46] : memref<1x32xf32, #tpu.memory_space<vmem>>, vector<1x32xf32>
    %c0_47 = arith.constant 0 : index
    %c0_48 = arith.constant 0 : index
    %122 = vector.load %arg5[%c0_47, %c0_48] : memref<1x32xf32, #tpu.memory_space<vmem>>, vector<1x32xf32>
    %cst_49 = arith.constant dense<0.000000e+00> : vector<8xf32>
    %123 = vector.multi_reduction <add>, %120, %cst_49 [1] : vector<8x32xf32> to vector<8xf32>
    %124 = vector.shape_cast %123 : vector<8xf32> to vector<8x1xf32>
    %cst_50 = arith.constant 3.200000e+01 : f32
    %125 = vector.broadcast %cst_50 : f32 to vector<8x1xf32>
    %126 = arith.divf %124, %125 : vector<8x1xf32>
    %127 = vector.broadcast %126 : vector<8x1xf32> to vector<8x32xf32>
    %128 = arith.subf %120, %127 : vector<8x32xf32>
    %129 = arith.mulf %128, %128 : vector<8x32xf32>
    %cst_51 = arith.constant dense<0.000000e+00> : vector<8xf32>
    %130 = vector.multi_reduction <add>, %129, %cst_51 [1] : vector<8x32xf32> to vector<8xf32>
    %131 = vector.shape_cast %130 : vector<8xf32> to vector<8x1xf32>
    %cst_52 = arith.constant 3.200000e+01 : f32
    %132 = vector.broadcast %cst_52 : f32 to vector<8x1xf32>
    %133 = arith.divf %131, %132 : vector<8x1xf32>
    %cst_53 = arith.constant 9.99999974E-6 : f32
    %134 = vector.broadcast %cst_53 : f32 to vector<8x1xf32>
    %135 = arith.addf %133, %134 : vector<8x1xf32>
    %136 = math.rsqrt %135 : vector<8x1xf32>
    %137 = vector.broadcast %136 : vector<8x1xf32> to vector<8x32xf32>
    %138 = arith.mulf %128, %137 : vector<8x32xf32>
    %139 = vector.broadcast %121 : vector<1x32xf32> to vector<8x32xf32>
    %140 = arith.mulf %138, %139 : vector<8x32xf32>
    %141 = vector.broadcast %122 : vector<1x32xf32> to vector<8x32xf32>
    %142 = arith.addf %140, %141 : vector<8x32xf32>
    %143 = arith.truncf %142 : vector<8x32xf32> to vector<8x32xbf16>
    %c0_54 = arith.constant 0 : index
    %c0_55 = arith.constant 0 : index
    %144 = vector.load %arg10[%c0_54, %c0_55] : memref<32x128xf32, #tpu.memory_space<vmem>>, vector<32x128xf32>
    %145 = arith.truncf %144 : vector<32x128xf32> to vector<32x128xbf16>
    %cst_56 = arith.constant dense<0.000000e+00> : vector<8x128xf32>
    %146 = tpu.matmul %143, %145, %cst_56 {dimension_numbers = #tpu.dot_dimension_numbers<[1], [0], [0], [1], [0, 0, 1, 1], [], []>} : vector<8x32xbf16>, vector<32x128xbf16>, vector<8x128xf32> -> vector<8x128xf32>
    %c0_57 = arith.constant 0 : index
    %c0_58 = arith.constant 0 : index
    %147 = vector.load %arg11[%c0_57, %c0_58] : memref<1x128xf32, #tpu.memory_space<vmem>>, vector<1x128xf32>
    %148 = vector.broadcast %147 : vector<1x128xf32> to vector<8x128xf32>
    %149 = arith.addf %146, %148 : vector<8x128xf32>
    %cst_59 = arith.constant 5.000000e-01 : f32
    %150 = vector.broadcast %cst_59 : f32 to vector<8x128xf32>
    %151 = arith.mulf %150, %149 : vector<8x128xf32>
    %cst_60 = arith.constant 4.471500e-02 : f32
    %152 = vector.broadcast %cst_60 : f32 to vector<8x128xf32>
    %153 = arith.mulf %152, %149 : vector<8x128xf32>
    %154 = arith.mulf %153, %149 : vector<8x128xf32>
    %155 = arith.mulf %154, %149 : vector<8x128xf32>
    %156 = arith.addf %149, %155 : vector<8x128xf32>
    %cst_61 = arith.constant 0.797884583 : f32
    %157 = vector.broadcast %cst_61 : f32 to vector<8x128xf32>
    %158 = arith.mulf %157, %156 : vector<8x128xf32>
    %159 = math.tanh %158 : vector<8x128xf32>
    %cst_62 = arith.constant 1.000000e+00 : f32
    %160 = vector.broadcast %cst_62 : f32 to vector<8x128xf32>
    %161 = arith.addf %160, %159 : vector<8x128xf32>
    %162 = arith.mulf %151, %161 : vector<8x128xf32>
    %163 = arith.truncf %162 : vector<8x128xf32> to vector<8x128xbf16>
    %c0_63 = arith.constant 0 : index
    %c0_64 = arith.constant 0 : index
    %164 = vector.load %arg12[%c0_63, %c0_64] : memref<128x32xf32, #tpu.memory_space<vmem>>, vector<128x32xf32>
    %165 = arith.truncf %164 : vector<128x32xf32> to vector<128x32xbf16>
    %cst_65 = arith.constant dense<0.000000e+00> : vector<8x32xf32>
    %166 = tpu.matmul %163, %165, %cst_65 {dimension_numbers = #tpu.dot_dimension_numbers<[1], [0], [0], [1], [0, 0, 1, 1], [], []>} : vector<8x128xbf16>, vector<128x32xbf16>, vector<8x32xf32> -> vector<8x32xf32>
    %c0_66 = arith.constant 0 : index
    %c0_67 = arith.constant 0 : index
    %167 = vector.load %arg13[%c0_66, %c0_67] : memref<1x32xf32, #tpu.memory_space<vmem>>, vector<1x32xf32>
    %168 = vector.broadcast %167 : vector<1x32xf32> to vector<8x32xf32>
    %169 = arith.addf %166, %168 : vector<8x32xf32>
    %170 = arith.addf %120, %169 : vector<8x32xf32>
    %c0_68 = arith.constant 0 : index
    %c0_69 = arith.constant 0 : index
    %171 = vector.load %arg14[%c0_68, %c0_69] : memref<8x32xf32, #tpu.memory_space<vmem>>, vector<8x32xf32>
    tpu.vector_store %arg14[%c0_68, %c0_69], %170 {strides = array<i32>} : memref<8x32xf32, #tpu.memory_space<vmem>>, vector<8x32xf32>,
    return
  }
  func.func @transform_0(%arg0: i32) -> (i32, i32) {
    %c0_i32 = arith.constant 0 : i32
    %c0_i32_0 = arith.constant 0 : i32
    return %arg0, %c0_i32 : i32, i32
  }
  func.func @transform_1(%arg0: i32) -> (i32, i32) {
    %c0_i32 = arith.constant 0 : i32
    %c0_i32_0 = arith.constant 0 : i32
    %c0_i32_1 = arith.constant 0 : i32
    return %c0_i32, %c0_i32_0 : i32, i32
  }
  func.func @transform_2(%arg0: i32) -> (i32, i32) {
    %c0_i32 = arith.constant 0 : i32
    %c0_i32_0 = arith.constant 0 : i32
    %c0_i32_1 = arith.constant 0 : i32
    return %c0_i32, %c0_i32_0 : i32, i32
  }
  func.func @transform_3(%arg0: i32) -> (i32, i32) {
    %c0_i32 = arith.constant 0 : i32
    %c0_i32_0 = arith.constant 0 : i32
    %c0_i32_1 = arith.constant 0 : i32
    return %c0_i32, %c0_i32_0 : i32, i32
  }
  func.func @transform_4(%arg0: i32) -> (i32, i32) {
    %c0_i32 = arith.constant 0 : i32
    %c0_i32_0 = arith.constant 0 : i32
    %c0_i32_1 = arith.constant 0 : i32
    return %c0_i32, %c0_i32_0 : i32, i32
  }
  func.func @transform_5(%arg0: i32) -> (i32, i32) {
    %c0_i32 = arith.constant 0 : i32
    %c0_i32_0 = arith.constant 0 : i32
    %c0_i32_1 = arith.constant 0 : i32
    return %c0_i32, %c0_i32_0 : i32, i32
  }
  func.func @transform_6(%arg0: i32) -> (i32, i32) {
    %c0_i32 = arith.constant 0 : i32
    %c0_i32_0 = arith.constant 0 : i32
    %c0_i32_1 = arith.constant 0 : i32
    return %c0_i32, %c0_i32_0 : i32, i32
  }
  func.func @transform_7(%arg0: i32) -> (i32, i32) {
    %c0_i32 = arith.constant 0 : i32
    %c0_i32_0 = arith.constant 0 : i32
    %c0_i32_1 = arith.constant 0 : i32
    return %c0_i32, %c0_i32_0 : i32, i32
  }
  func.func @transform_8(%arg0: i32) -> (i32, i32) {
    %c0_i32 = arith.constant 0 : i32
    %c0_i32_0 = arith.constant 0 : i32
    %c0_i32_1 = arith.constant 0 : i32
    return %c0_i32, %c0_i32_0 : i32, i32
  }
  func.func @transform_9(%arg0: i32) -> (i32, i32) {
    %c0_i32 = arith.constant 0 : i32
    %c0_i32_0 = arith.constant 0 : i32
    %c0_i32_1 = arith.constant 0 : i32
    return %c0_i32, %c0_i32_0 : i32, i32
  }
  func.func @transform_10(%arg0: i32) -> (i32, i32) {
    %c0_i32 = arith.constant 0 : i32
    %c0_i32_0 = arith.constant 0 : i32
    %c0_i32_1 = arith.constant 0 : i32
    return %c0_i32, %c0_i32_0 : i32, i32
  }
  func.func @transform_11(%arg0: i32) -> (i32, i32) {
    %c0_i32 = arith.constant 0 : i32
    %c0_i32_0 = arith.constant 0 : i32
    %c0_i32_1 = arith.constant 0 : i32
    return %c0_i32, %c0_i32_0 : i32, i32
  }
  func.func @transform_12(%arg0: i32) -> (i32, i32) {
    %c0_i32 = arith.constant 0 : i32
    %c0_i32_0 = arith.constant 0 : i32
    %c0_i32_1 = arith.constant 0 : i32
    return %c0_i32, %c0_i32_0 : i32, i32
  }
  func.func @transform_13(%arg0: i32) -> (i32, i32) {
    %c0_i32 = arith.constant 0 : i32
    %c0_i32_0 = arith.constant 0 : i32
    return %arg0, %c0_i32 : i32, i32
  }
}

</mosaic_0001>

<bundles_post_ra>
// kernel: tpu_custom_call.1
= control target key start
LH: loop header
LB: loop body
LE: loop exit
PB: predicated region body
PF: predicated region fallthrough
CT: control target
= control target key end

     0   :  { %s1562_s0 = inlined_call_operand.vmem [shape: f32[16,32], index: 0, kind: input, shape index: {}]   ;;  %s1563_s1 = inlined_call_operand.vmem [shape: f32[1,32], index: 1, kind: input, shape index: {}]   ;;  %s1564_s2 = inlined_call_operand.vmem [shape: f32[1,32], index: 2, kind: input, shape index: {}]   ;;  %s1565_s3 = inlined_call_operand.vmem [shape: f32[1,32], index: 3, kind: input, shape index: {}]   ;;  %s1566_s4 = inlined_call_operand.vmem [shape: f32[1,32], index: 4, kind: input, shape index: {}]   ;;  %s1567_s5 = inlined_call_operand.vmem [shape: f32[32,96], index: 5, kind: input, shape index: {}]   ;;  %s1568_s6 = inlined_call_operand.vmem [shape: f32[1,96], index: 6, kind: input, shape index: {}]   ;;  %s1569_s7 = inlined_call_operand.vmem [shape: f32[32,32], index: 7, kind: input, shape index: {}]   ;;  %s1570_s8 = inlined_call_operand.vmem [shape: f32[1,32], index: 8, kind: input, shape index: {}]   ;;  %s1571_s9 = inlined_call_operand.vmem [shape: f32[32,128], index: 9, kind: input, shape index: {}]   ;;  %s1572_s10 = inlined_call_operand.vmem [shape: f32[1,128], index: 10, kind: input, shape index: {}]   ;;  %s1573_s11 = inlined_call_operand.vmem [shape: f32[128,32], index: 11, kind: input, shape index: {}]   ;;  %s1574_s12 = inlined_call_operand.vmem [shape: f32[1,32], index: 12, kind: input, shape index: {}]   ;;  %s1575_s13 = inlined_call_operand.hbm [shape: f32[16,32], index: 13, kind: output, shape index: {}]  }
   0x1   :  { %1576 = sst [smem:[#allocation6_spill]] %s1562_s0 }
   0x2   :  { %1577 = sst [smem:[#allocation7_spill]] %s1563_s1 }
   0x3   :  { %1578 = sst [smem:[#allocation8_spill]] %s1564_s2 }
   0x4   :  { %1579 = sst [smem:[#allocation9_spill]] %s1565_s3 }
   0x5   :  { %18 = vsyncpa [#allocation4], 0 }
   0x6   :  { %20 = vsyncpa [#allocation4 + $0x1], 0  ;;  %s1289_s25 = smov 0   ;;  %s1291_s26 = smov 0  }
   0x7   :  { %s1293_s27 = smov 0   ;;  %s1295_s28 = smov 0  }
   0x8 LB: > { %s1310_s29 = sadd.s32 4294967295, %s1201_s28   ;;  %s1031_s30 = sadd.s32 4294967294, %s1201_s28   ;;  %s1201_s28 = sphi %s1295_s28, %s1589_s28   ;;  %s1197_s27 = sphi %s1293_s27, %s1588_s27   ;;  %s1193_s26 = sphi %s1291_s26, %s1587_s26   ;;  %s1189_s25 = sphi %s1289_s25, %s1586_s25  }
   0x9   : > { %s1314_s14 = sadd.s32 1, %s1201_s28   ;;  %s311_s15 = sadd.s32 1, %s1197_s27 }
   0xa   : > { %s308_s16 = ssub.s32 %s1201_s28, %s1314_s14  ;;  %p321_p0 = scmp.ne.s32.totalorder %s1197_s27, %s1193_s26 }
   0xb   : > { %p309_p1 = scmp.eq.s32.totalorder %s308_s16, 0  ;;  %p322_p2 = scmp.eq.s32.totalorder %s1310_s29, 1 }
   0xc   : > { %p327_p3 = scmp.ne.s32.totalorder %s1193_s26, %s1189_s25  ;;  %p328_p4 = scmp.eq.s32.totalorder %s1031_s30, 1 }
   0xd   : > { %s1325_s17 = scalar_select %p309_p1, %s1197_s27, %s311_s15  }
   0xe   : > { %p1327_p5 = por %p322_p2, %p321_p0  ;;  %p1331_p6 = por %p328_p4, %p327_p3 }
   0xf   : > { %p1034_p7 = scmp.ge.s32.totalorder %s1201_s28, 1  ;;  %p389_p8 = scmp.lt.s32.totalorder %s1201_s28, 3 }
  0x11   : > { %p390_p9 = pnand %p1034_p7, %p389_p8 }
  0x12   : > { %p432_p10 = scmp.lt.s32.totalorder (!%p390_p9), %s1310_s29, 1  ;;  %s1582_s0 = sld [smem:[#allocation6_spill]] (!%p390_p9) }
  0x13   : > { %393 = sbr.rel (%p390_p9) target bundleno = 2446 (0x98e), region = 72  ;;  %s1583_s1 = sld [smem:[#allocation7_spill]] (!%p390_p9) }
  0x14   : > { %s1584_s2 = sld [smem:[#allocation8_spill]] (!%p390_p9)  ;;  %s1204_s23 = smov (!%p390_p9), 88  }
  0x15   : > { %s1206_s30 = smov (!%p390_p9), 96   ;;  %s1207_s15 = smov (!%p390_p9), 72  }
  0x16   : > { %s1208_s16 = smov (!%p390_p9), 80   ;;  %s1212_s22 = smov (!%p390_p9), 112  }
  0x17   : > { %s1585_s3 = sld [smem:[#allocation9_spill]] (!%p390_p9) }
  0x18   : > { %s433_s20 = scalar_select %p432_p10, %s1310_s29, 1  ;;  %vm440_vm0 = vcmask 261120   ;;  %v1203_v2 = vmov 32.0   ;;  %v481_v14 = vld [vmem:[%s1567_s5 + $0x10] sm:$0xff]  ;;  %v482_v15 = vld [vmem:[%s1567_s5 + $0x18] sm:$0xff]  ;;  %v479_v17 = vld [vmem:[%s1567_s5] sm:$0xff]  ;;  %v505_v55 = vlaneseq }
  0x19   : > { %1115 = vrcp.f32 %v1203_v2  ;;  %v484_v16 = vpack.c.bf16 %v482_v15, %v481_v14  ;;  %v480_v18 = vld [vmem:[%s1567_s5 + $0x8] sm:$0xff]  ;;  %v1107_v29 = vld [vmem:[%s1583_s1] ss:$0 sm:$0xff]  ;;  %vm569_vm5 = vcmask 1043456   ;;  %vm519_vm6 = vcmask 64512   ;;  %s429_s1 = sand.u32 1, %s1193_s26  }
  0x1a   : > { %s1036_s21 = sshll.u32 %s433_s20, 3  ;;  %v483_v19 = vpack.c.bf16 %v480_v18, %v479_v17  ;;  %v1108_v32 = vld [vmem:[%s1584_s2] ss:$0 sm:$0xff]  ;;  %v506_v56 = vshrl.u32 %v505_v55, 7  ;;  %v508_v57 = vand.u32 127, %v505_v55  ;;  %s1210_s20 = smov 120  }
  0x1b   : > { %s435_s24 = scalar_lea.vmem %s1582_s0, %s1036_s21  ;;  %498 = vmatpush.bf16.msra.mxu0 %v484_v16  ;;  %v1109_v36 = vld [vmem:[%s1568_s6] ss:$0 sm:$0xff]  ;;  %v1209_v58 = vmov -1e+30   ;;  %s1211_s21 = smov 104  }
  0x1c   : > { %v1342_v0 = vld [vmem:[%s435_s24] sm:$0xff]  ;;  %s1205_s24 = smov 64   ;;  %vm509_vm7 = vcmp.ge.s32.totalorder %v506_v56, %v508_v57  ;;  %s1049_s0 = sshll.u32 %s1310_s29, 3 }
  0x1d   : > { %v441_v1 = vsel %vm440_vm0, %v1342_v0, 0.0  ;;  %v1387_v59 = vsel %vm509_vm7, 0.0, %v1209_v58  ;;  %s957_s29 = scalar_lea.sflag [#allocation4], %s429_s1 }
  0x1e   : > { %442 = vadd.xlane.f32.xlu0 %v441_v1 }
  0x1f   : > { %v1116_v3 = vpop.eup %1115  ;;  %499 = vmatpush.bf16.msra.mxu0 %v483_v19 }
  0x20   : > { %v445_v4 = vmul.f32 32.0, %v1116_v3  ;;  %vm449_vm1 = vweird.f32 %v1116_v3 }
  0x22   : > { %v446_v5 = vsub.f32 1.0, %v445_v4 }
  0x24   : > { %v447_v6 = vmul.f32 %v1116_v3, %v446_v5 }
  0x26   : > { %v448_v7 = vadd.f32 %v1116_v3, %v447_v6 }
  0x28   : > { %v1346_v8 = vsel %vm449_vm1, %v1116_v3, %v448_v7 }
  0x91   : > { %v443_v9 = vpop.xlane.xlu0 %442 }
  0x92   : > { %v451_v10 = vmul.f32 %v1346_v8, %v443_v9 }
  0x94   : > { %v452_v11 = vsub.f32 %v1342_v0, %v451_v10 }
  0x96   : > { %v453_v12 = vmul.f32 %v452_v11, %v452_v11 }
  0x98   : > { %v454_v13 = vsel %vm440_vm0, %v453_v12, 0.0 }
  0x99   : > { %455 = vadd.xlane.f32.xlu0 %v454_v13 }
 0x10c   : > { %v456_v20 = vpop.xlane.xlu0 %455 }
 0x10d   : > { %v457_v21 = vmul.f32 %v456_v20, %v1346_v8 }
 0x10f   : > { %v458_v22 = vadd.f32 1e-05, %v457_v21 }
 0x111   : > { %1117 = vrsqrt.f32 %v458_v22  ;;  %vm465_vm3 = vweird.f32 %v458_v22 }
 0x117   : > { %v1118_v23 = vpop.eup %1117 }
 0x118   : > { %v460_v24 = vmul.f32 %v1118_v23, %v458_v22  ;;  %vm466_vm2 = vweird.f32 %v1118_v23 }
 0x119   : > { %vm467_vm4 = vmor %vm465_vm3, %vm466_vm2 }
 0x11a   : > { %v461_v25 = vmul.f32 %v1118_v23, %v460_v24 }
 0x11c   : > { %v462_v26 = vmul.f32 0.5, %v461_v25 }
 0x11e   : > { %v463_v27 = vsub.f32 1.5, %v462_v26 }
 0x120   : > { %v464_v28 = vmul.f32 %v1118_v23, %v463_v27 }
 0x122   : > { %v468_v30 = vsel %vm467_vm4, %v1118_v23, %v464_v28 }
 0x123   : > { %v469_v31 = vmul.f32 %v468_v30, %v452_v11 }
 0x125   : > { %v473_v33 = vmul.f32 %v1107_v29, %v469_v31 }
 0x127   : > { %v477_v34 = vadd.f32 %v1108_v32, %v473_v33 }
 0x129   : > { %v478_v35 = vpack.c.bf16 %v477_v34, %v477_v34 }
 0x12b   : > { %1037 = vmatmul.msk.bf16.vlgmr.msra.gmra.mxu0 %vm440_vm0, %v478_v35 }
 0x1a8   : > { %v501_v37 = vpop.f32.mrf.mxu0 }
 0x1a9   : > { %v502_v38 = vadd.f32 %v1109_v36, %v501_v37 }
 0x1ab   : > { %v513_v39 = vpack.c.bf16 %v502_v38, %v502_v38  ;;  %v511_v49 = vmul.f32 0.35355338, %v502_v38 }
 0x1ad   : > { %v515_v40 = vunpack.c.l.b16 %v513_v39  ;;  %v512_v50 = vpack.c.bf16 %v511_v49, %v511_v49 }
 0x1af   : > { %v1374_v41 = vpack.c.b16 %v515_v40, %v515_v40  ;;  %v588_v6 = vunpack.c.l.b16 %v512_v50 }
 0x1b0   : > { %v503_v42 = vpop.f32.mrf.mxu0 }
 0x1b1   : > { %592 = vrot.lane.b32.xlu0 %v1374_v41, %s1204_s23  ;;  %564 = vrot.lane.b32.xlu2 %v1374_v41, %s1205_s24  ;;  %v589_v7 = vpack.c.b16 %v588_v6, %v588_v6  ;;  %s1213_s23 = smov 40   ;;  %s1214_s24 = smov 56  }
 0x1b2   : > { %517 = vrot.lane.b32.xlu1 %v1374_v41, %s1206_s30  ;;  %s1215_s30 = smov 48  }
 0x1b9   : > { %742 = vrot.lane.b32.xlu0 %v1374_v41, %s1207_s15  ;;  %s1216_s15 = smov 8  }
 0x1c1   : > { %667 = vrot.lane.b32.xlu0 %v1374_v41, %s1208_s16  ;;  %s1217_s16 = smov 16  }
 0x20b   : > { %v565_v43 = vpop.permute.xlu2 %564 }
 0x20c   : > { %v571_v44 = vsel %vm569_vm5, %v565_v43, 0 }
 0x20d   : > { %580 = vmatpush.bf16.msra.mxu2 %v571_v44 }
 0x223   : > { %v593_v45 = vpop.permute.xlu0 %592 }
 0x224   : > { %v518_v46 = vpop.permute.xlu1 %517  ;;  %v598_v47 = vsel %vm519_vm6, %v593_v45, 0 }
 0x225   : > { %v524_v48 = vsel %vm519_vm6, %v518_v46, 0  ;;  %607 = vmatpush.bf16.xpose.msrb.mxu2 %v598_v47 }
 0x226   : > { %533 = vmatpush.bf16.xpose.msra.mxu1 %v524_v48 }
 0x22b   : > { %v743_v51 = vpop.permute.xlu0 %742 }
 0x22c   : > { %v748_v52 = vsel %vm519_vm6, %v743_v51, 0 }
 0x22d   : > { %1038 = vmatmul.msk.bf16.vlgmr.msra.gmra.mxu1 %vm519_vm6, %v512_v50  ;;  %757 = vmatpush.bf16.xpose.msra.mxu3 %v748_v52 }
 0x233   : > { %v668_v53 = vpop.permute.xlu0 %667 }
 0x234   : > { %v673_v54 = vsel %vm519_vm6, %v668_v53, 0 }
 0x235   : > { %682 = vmatpush.bf16.xpose.msrb.mxu0 %v673_v54 }
 0x2aa   : > { %v535_v60 = vpop.f32.mrf.mxu1 }
 0x2ab   : > { %v536_v61 = vadd.f32 %v535_v60, %v1387_v59 }
 0x2ad   : > { %v539_v62 = vsel %vm519_vm6, %v536_v61, -inf }
 0x2ae   : > { %540 = vmax.xlane.f32.xlu1 %v539_v62 }
 0x2b2   : > { %v537_v63 = vpop.f32.mrf.mxu1 }
 0x321   : > { %v541_v1 = vpop.xlane.xlu1 %540 }
 0x322   : > { %v542_v2 = vsub.f32 %v536_v61, %v541_v1 }
 0x324   : > { %v543_v3 = vmul.f32 1.442695, %v542_v2 }
 0x326   : > { %1119 = vpow2.f32 %v543_v3 }
 0x32c   : > { %v1120_v4 = vpop.eup %1119 }
 0x32d   : > { %v545_v5 = vsel %vm519_vm6, %v1120_v4, 0.0 }
 0x32e   : > { %546 = vadd.xlane.f32.xlu2 %v545_v5 }
 0x346   : > { %590 = vrot.lane.b32.xlu2 %v589_v7, %s1210_s20  ;;  %s1218_s20 = smov 24  }
 0x34e   : > { %740 = vrot.lane.b32.xlu2 %v589_v7, %s1211_s21 }
 0x356   : > { %665 = vrot.lane.b32.xlu2 %v589_v7, %s1212_s22 }
 0x3a1   : > { %v547_v9 = vpop.xlane.xlu2 %546 }
 0x3a2   : > { %1121 = vrcp.f32 %v547_v9  ;;  %v559_v14 = vand.u32 2147483648, %v547_v9  ;;  %v557_v16 = vand.u32 2147483647, %v547_v9  ;;  %vm553_vm9 = vweird.f32 %v547_v9 }
 0x3a4   : > { %v560_v18 = vor.u32 1.1754944e-38, %v559_v14  ;;  %vm558_vm11 = vcmp.eq.f32.partialorder %v557_v16, 8.507059e+37 }
 0x3a8   : > { %v1122_v10 = vpop.eup %1121 }
 0x3a9   : > { %v549_v11 = vmul.f32 %v1122_v10, %v547_v9  ;;  %v591_v12 = vpop.permute.xlu2 %590  ;;  %vm554_vm8 = vweird.f32 %v1122_v10 }
 0x3aa   : > { %vm555_vm10 = vmor %vm553_vm9, %vm554_vm8 }
 0x3ab   : > { %v550_v13 = vsub.f32 1.0, %v549_v11 }
 0x3ad   : > { %v551_v15 = vmul.f32 %v1122_v10, %v550_v13 }
 0x3af   : > { %v552_v17 = vadd.f32 %v1122_v10, %v551_v15 }
 0x3b1   : > { %v741_v19 = vpop.permute.xlu2 %740  ;;  %v556_v20 = vsel %vm555_vm10, %v1122_v10, %v552_v17 }
 0x3b2   : > { %1044 = vmatmul.msk.bf16.vlgmr.msra.gmra.mxu3 %vm519_vm6, %v741_v19  ;;  %v561_v21 = vsel %vm558_vm11, %v560_v18, %v556_v20  ;;  %vm813_vm11 = vcmask 261312  }
 0x3b3   : > { %v562_v22 = vmul.f32 %v1120_v4, %v561_v21 }
 0x3b5   : > { %v563_v23 = vpack.c.bf16 %v562_v22, %v562_v22 }
 0x3b7   : > { %1039 = vmatmul.msk.bf16.vlgmr.msra.gmra.mxu2 %vm519_vm6, %v563_v23 }
 0x3b9   : > { %v666_v24 = vpop.permute.xlu2 %665 }
 0x3ba   : > { %1042 = vmatmul.msk.bf16.vlgmr.msrb.gmra.mxu0 %vm519_vm6, %v666_v24 }
 0x3c7   : > { %1040 = vmatmul.msk.bf16.vlgmr.msrb.gmra.mxu2 %vm519_vm6, %v591_v12 }
 0x435   : > { %v759_v25 = vpop.f32.mrf.mxu3 }
 0x436   : > { %v760_v26 = vadd.f32 %v759_v25, %v1387_v59 }
 0x437   : > { %v684_v27 = vpop.f32.mrf.mxu0 }
 0x438   : > { %v685_v28 = vadd.f32 %v684_v27, %v1387_v59  ;;  %v763_v29 = vsel %vm519_vm6, %v760_v26, -inf }
 0x439   : > { %764 = vmax.xlane.f32.xlu0 %v763_v29 }
 0x43a   : > { %v582_v30 = vpop.f32.mrf.mxu2  ;;  %v688_v31 = vsel %vm519_vm6, %v685_v28, -inf }
 0x43b   : > { %586 = vst.msk [vmem:[#allocation2] sm:$0xff] %vm519_vm6, %v582_v30  ;;  %689 = vmax.xlane.f32.xlu2 %v688_v31 }
 0x43d   : > { %v761_v32 = vpop.f32.mrf.mxu3 }
 0x43f   : > { %v686_v33 = vpop.f32.mrf.mxu0 }
 0x442   : > { %v584_v34 = vpop.f32.mrf.mxu2 }
 0x44a   : > { %v609_v35 = vpop.f32.mrf.mxu2 }
 0x44b   : > { %v610_v48 = vadd.f32 %v609_v35, %v1387_v59 }
 0x44d   : > { %v613_v49 = vsel %vm519_vm6, %v610_v48, -inf }
 0x452   : > { %v611_v36 = vpop.f32.mrf.mxu2 }
 0x453   : > { %788 = vrot.lane.b32.xlu2 %v1374_v41, %s1213_s23 }
 0x4ac   : > { %v765_v37 = vpop.xlane.xlu0 %764 }
 0x4ad   : > { %v766_v38 = vsub.f32 %v760_v26, %v765_v37 }
 0x4ae   : > { %v690_v39 = vpop.xlane.xlu2 %689 }
 0x4af   : > { %v767_v40 = vmul.f32 1.442695, %v766_v38  ;;  %v691_v42 = vsub.f32 %v685_v28, %v690_v39 }
 0x4b1   : > { %1123 = vpow2.f32 %v767_v40  ;;  %v692_v43 = vmul.f32 1.442695, %v691_v42 }
 0x4b3   : > { %1125 = vpow2.f32 %v692_v43 }
 0x4b6   : > { %v789_v56 = vpop.permute.xlu2 %788 }
 0x4b7   : > { %v1402_v44 = vpop.eup %1123  ;;  %v794_v59 = vsel %vm569_vm5, %v789_v56, 0 }
 0x4b8   : > { %v769_v45 = vsel %vm519_vm6, %v1402_v44, 0.0 }
 0x4b9   : > { %v1406_v46 = vpop.eup %1125  ;;  %770 = vadd.xlane.f32.xlu1 %v769_v45  ;;  %v819_v45 = vld [vmem:[%s1569_s7 + $0x10] sm:$0xff] }
 0x4ba   : > { %v694_v47 = vsel %vm519_vm6, %v1406_v46, 0.0 }
 0x4bb   : > { %695 = vadd.xlane.f32.xlu0 %v694_v47 }
 0x4c1   : > { %614 = vmax.xlane.f32.xlu1 %v613_v49 }
 0x4da   : > { %638 = vrot.lane.b32.xlu1 %v1374_v41, %s1214_s24  ;;  %s967_s24 = scalar_lea.hbm %s1575_s13, %s1049_s0 }
 0x4db   : > { %s971_s2 = sshll.u32 %s967_s24, 4  ;;  %s972_s2 = int_to_ptr.hbm [resolvable:$true] %s971_s2 }
 0x52c   : > { %v1413_v50 = vpop.xlane.xlu1 %770 }
 0x52d   : > { %v783_v26 = vand.u32 2147483648, %v1413_v50  ;;  %vm777_vm8 = vweird.f32 %v1413_v50  ;;  %v781_v28 = vand.u32 2147483647, %v1413_v50 }
 0x52e   : > { %v696_v60 = vpop.xlane.xlu0 %695 }
 0x52f   : > { %v708_v13 = vand.u32 2147483648, %v696_v60  ;;  %vm702_vm15 = vweird.f32 %v696_v60  ;;  %v706_v15 = vand.u32 2147483647, %v696_v60  ;;  %v784_v32 = vor.u32 1.1754944e-38, %v783_v26 }
 0x530   : > { %vm782_vm10 = vcmp.eq.f32.partialorder %v781_v28, 8.507059e+37 }
 0x531   : > { %v709_v21 = vor.u32 1.1754944e-38, %v708_v13  ;;  %vm707_vm4 = vcmp.eq.f32.partialorder %v706_v15, 8.507059e+37  ;;  %v926_v13 = vld [vmem:[%s1573_s11 + $0x68] sm:$0xff] }
 0x534   : > { %v615_v51 = vpop.xlane.xlu1 %614 }
 0x535   : > { %v616_v52 = vsub.f32 %v610_v48, %v615_v51  ;;  %v818_v48 = vld [vmem:[%s1569_s7 + $0x8] sm:$0xff] }
 0x537   : > { %v617_v53 = vmul.f32 1.442695, %v616_v52 }
 0x539   : > { %1127 = vpow2.f32 %v617_v53 }
 0x53a   : > { %1129 = vrcp.f32 %v696_v60 }
 0x53b   : > { %1131 = vrcp.f32 %v1413_v50 }
 0x53f   : > { %v1128_v54 = vpop.eup %1127 }
 0x540   : > { %v619_v55 = vsel %vm519_vm6, %v1128_v54, 0.0  ;;  %v1130_v61 = vpop.eup %1129 }
 0x541   : > { %620 = vadd.xlane.f32.xlu1 %v619_v55  ;;  %v698_v63 = vmul.f32 %v1130_v61, %v696_v60  ;;  %v1132_v2 = vpop.eup %1131  ;;  %vm703_vm13 = vweird.f32 %v1130_v61  ;;  %v1110_v55 = vld [vmem:[%s1570_s8] ss:$0 sm:$0xff] }
 0x542   : > { %v773_v6 = vmul.f32 %v1132_v2, %v1413_v50  ;;  %vm704_vm2 = vmor %vm702_vm15, %vm703_vm13  ;;  %vm778_vm7 = vweird.f32 %v1132_v2 }
 0x543   : > { %v699_v1 = vsub.f32 1.0, %v698_v63  ;;  %vm779_vm9 = vmor %vm777_vm8, %vm778_vm7 }
 0x544   : > { %v774_v12 = vsub.f32 1.0, %v773_v6  ;;  %v878_v6 = vld [vmem:[%s1571_s9 + $0x8] sm:$0xff] }
 0x545   : > { %v700_v5 = vmul.f32 %v1130_v61, %v699_v1 }
 0x546   : > { %v775_v20 = vmul.f32 %v1132_v2, %v774_v12 }
 0x547   : > { %v701_v11 = vadd.f32 %v1130_v61, %v700_v5  ;;  %v877_v5 = vld [vmem:[%s1571_s9] sm:$0xff] }
 0x548   : > { %v776_v25 = vadd.f32 %v1132_v2, %v775_v20 }
 0x549   : > { %v705_v19 = vsel %vm704_vm2, %v1130_v61, %v701_v11 }
 0x54a   : > { %v710_v24 = vsel %vm707_vm4, %v709_v21, %v705_v19  ;;  %v780_v31 = vsel %vm779_vm9, %v1132_v2, %v776_v25  ;;  %v1112_v25 = vld [vmem:[%s1566_s4] ss:$0 sm:$0xff] }
 0x54b   : > { %v711_v27 = vmul.f32 %v1406_v46, %v710_v24  ;;  %v785_v34 = vsel %vm782_vm10, %v784_v32, %v780_v31  ;;  %v817_v46 = vld [vmem:[%s1569_s7] sm:$0xff] }
 0x54c   : > { %v639_v57 = vpop.permute.xlu1 %638  ;;  %v786_v35 = vmul.f32 %v1402_v44, %v785_v34  ;;  %v820_v44 = vld [vmem:[%s1569_s7 + $0x18] sm:$0xff]  ;;  %v821_v49 = vpack.c.bf16 %v818_v48, %v817_v46  ;;  %v921_v32 = vld [vmem:[%s1573_s11 + $0x40] sm:$0xff]  ;;  %v914_v46 = vld [vmem:[%s1573_s11 + $0x8] sm:$0xff] }
 0x54d   : > { %v644_v58 = vsel %vm569_vm5, %v639_v57, 0  ;;  %v712_v33 = vpack.c.bf16 %v711_v27, %v711_v27  ;;  %v822_v47 = vpack.c.bf16 %v820_v44, %v819_v45  ;;  %v913_v44 = vld [vmem:[%s1573_s11] sm:$0xff] }
 0x54e   : > { %653 = vmatpush.bf16.msra.mxu2 %v644_v58  ;;  %v787_v36 = vpack.c.bf16 %v786_v35, %v786_v35  ;;  %v919_v35 = vld [vmem:[%s1573_s11 + $0x30] sm:$0xff]  ;;  %v1113_v48 = vld [vmem:[%s1572_s10] ss:$0 sm:$0xff] }
 0x54f   : > { %836 = vmatpush.bf16.msra.mxu0 %v822_v47  ;;  %v929_v47 = vpack.c.bf16 %v914_v46, %v913_v44 }
 0x552   : > { %803 = vmatpush.bf16.msrb.mxu2 %v794_v59 }
 0x553   : > { %837 = vmatpush.bf16.msra.mxu0 %v821_v49 }
 0x55a   : > { %713 = vrot.lane.b32.xlu1 %v1374_v41, %s1215_s30 }
 0x5b4   : > { %v621_v62 = vpop.xlane.xlu1 %620 }
 0x5b5   : > { %1133 = vrcp.f32 %v621_v62  ;;  %v633_v9 = vand.u32 2147483648, %v621_v62  ;;  %v631_v41 = vand.u32 2147483647, %v621_v62  ;;  %vm627_vm14 = vweird.f32 %v621_v62 }
 0x5b7   : > { %v634_v16 = vor.u32 1.1754944e-38, %v633_v9  ;;  %vm632_vm3 = vcmp.eq.f32.partialorder %v631_v41, 8.507059e+37  ;;  %v927_v9 = vld [vmem:[%s1573_s11 + $0x70] sm:$0xff]  ;;  %v925_v41 = vld [vmem:[%s1573_s11 + $0x60] sm:$0xff] }
 0x5b8   : > { %v935_v15 = vpack.c.bf16 %v926_v13, %v925_v41 }
 0x5bb   : > { %v1134_v3 = vpop.eup %1133 }
 0x5bc   : > { %v623_v4 = vmul.f32 %v1134_v3, %v621_v62  ;;  %vm628_vm12 = vweird.f32 %v1134_v3 }
 0x5bd   : > { %vm629_vm1 = vmor %vm627_vm14, %vm628_vm12 }
 0x5be   : > { %v624_v7 = vsub.f32 1.0, %v623_v4 }
 0x5c0   : > { %v625_v10 = vmul.f32 %v1134_v3, %v624_v7  ;;  %v881_v7 = vpack.c.bf16 %v878_v6, %v877_v5 }
 0x5c2   : > { %v626_v14 = vadd.f32 %v1134_v3, %v625_v10  ;;  %v928_v10 = vld [vmem:[%s1573_s11 + $0x78] sm:$0xff] }
 0x5c3   : > { %v936_v12 = vpack.c.bf16 %v928_v10, %v927_v9 }
 0x5c4   : > { %v630_v17 = vsel %vm629_vm1, %v1134_v3, %v626_v14  ;;  %v879_v3 = vld [vmem:[%s1571_s9 + $0x10] sm:$0xff] }
 0x5c5   : > { %v635_v18 = vsel %vm632_vm3, %v634_v16, %v630_v17  ;;  %941 = vmatpush.bf16.msrb.mxu3 %v936_v12 }
 0x5c6   : > { %v636_v22 = vmul.f32 %v1128_v54, %v635_v18 }
 0x5c8   : > { %v637_v23 = vpack.c.bf16 %v636_v22, %v636_v22 }
 0x5c9   : > { %942 = vmatpush.bf16.msrb.mxu3 %v935_v15 }
 0x5ca   : > { %1041 = vmatmul.msk.bf16.vlgmr.msra.gmra.mxu2 %vm519_vm6, %v637_v23  ;;  %v1111_v23 = vld [vmem:[%s1585_s3] ss:$0 sm:$0xff]  ;;  %s1153_s3 = sshra.s32 %s972_s2, 4  ;;  %s1154_s3 = int_to_ptr.hbm [resolvable:$true] %s1153_s3 }
 0x5cb   : > { %p1160_p0 = scmp.lt.s32.totalorder %s1154_s3, %s1575_s13 }
 0x5cc   : > { %v714_v29 = vpop.permute.xlu1 %713 }
 0x5cd   : > { %v719_v30 = vsel %vm569_vm5, %v714_v29, 0  ;;  %vm663_vm5 = vcmask 130112   ;;  %v923_v29 = vld [vmem:[%s1573_s11 + $0x50] sm:$0xff] }
 0x5ce   : > { %728 = vmatpush.bf16.msrb.mxu1 %v719_v30  ;;  %v924_v30 = vld [vmem:[%s1573_s11 + $0x58] sm:$0xff] }
 0x5cf   : > { %v934_v31 = vpack.c.bf16 %v924_v30, %v923_v29 }
 0x5d1   : > { %1043 = vmatmul.msk.bf16.vlgmr.msrb.gmra.mxu1 %vm519_vm6, %v712_v33  ;;  %943 = vmatpush.bf16.msrb.mxu3 %v934_v31  ;;  %v922_v33 = vld [vmem:[%s1573_s11 + $0x48] sm:$0xff] }
 0x5d2   : > { %v933_v34 = vpack.c.bf16 %v922_v33, %v921_v32 }
 0x5d5   : > { %944 = vmatpush.bf16.msrb.mxu3 %v933_v34 }
 0x5da   : > { %1045 = vmatmul.msk.bf16.vlgmr.msrb.gmra.mxu2 %vm519_vm6, %v787_v36  ;;  %vm738_vm6 = vcmask 195712   ;;  %v920_v36 = vld [vmem:[%s1573_s11 + $0x38] sm:$0xff] }
 0x64d   : > { %v655_v37 = vpop.f32.mrf.mxu2 }
 0x64e   : > { %660 = vrot.lane.b32.xlu0 %v655_v37, %s1216_s15  ;;  %v730_v38 = vpop.f32.mrf.mxu1  ;;  %v932_v37 = vpack.c.bf16 %v920_v36, %v919_v35 }
 0x64f   : > { %735 = vrot.lane.b32.xlu1 %v730_v38, %s1217_s16  ;;  %v917_v38 = vld [vmem:[%s1573_s11 + $0x20] sm:$0xff]  ;;  %s1035_s16 = sshll.u32 %s429_s1, 3 }
 0x650   : > { %945 = vmatpush.bf16.msrb.mxu3 %v932_v37  ;;  %s431_s30 = scalar_lea.vmem [#allocation3], %s1035_s16  ;;  %s1159_s16 = scalar_lea.hbm %s1575_s13, 16 }
 0x651   : > { %s969_s15 = sshll.u32 %s431_s30, 4  ;;  %s970_s15 = int_to_ptr.vmem [resolvable:$true] %s969_s15 }
 0x655   : > { %v657_v39 = vpop.f32.mrf.mxu2 }
 0x656   : > { %v732_v40 = vpop.f32.mrf.mxu1  ;;  %v918_v39 = vld [vmem:[%s1573_s11 + $0x28] sm:$0xff] }
 0x657   : > { %v931_v40 = vpack.c.bf16 %v918_v39, %v917_v38 }
 0x659   : > { %946 = vmatpush.bf16.msrb.mxu3 %v931_v40 }
 0x65d   : > { %v805_v42 = vpop.f32.mrf.mxu2 }
 0x65e   : > { %810 = vrot.lane.b32.xlu1 %v805_v42, %s1218_s20  ;;  %v915_v42 = vld [vmem:[%s1573_s11 + $0x10] sm:$0xff]  ;;  %s1155_s20 = scalar_lea.hbm %s1154_s3, 8 }
 0x65f   : > { %p1156_p11 = scmp.ne.s32.totalorder %s1154_s3, %s1155_s20  ;;  %p1161_p1 = scmp.lt.s32.totalorder %s1159_s16, %s1155_s20 }
 0x661   : > { %p1157_p12 = pnand %p1156_p11, %p1327_p5  ;;  %p1162_p2 = por %p1161_p1, %p1160_p0 }
 0x663   : > { %p1158_p13 = pneg %p1157_p12 }
 0x665   : > { %v807_v43 = vpop.f32.mrf.mxu2  ;;  %p1163_p3 = pnand %p1162_p2, %p1158_p13 }
 0x666   : > { %v916_v43 = vld [vmem:[%s1573_s11 + $0x18] sm:$0xff] }
 0x667   : > { %v930_v45 = vpack.c.bf16 %v916_v43, %v915_v42 }
 0x669   : > { %947 = vmatpush.bf16.msrb.mxu3 %v930_v45 }
 0x66d   : > { %948 = vmatpush.bf16.msrb.mxu3 %v929_v47 }
 0x6c0   : > { %v661_v50 = vpop.permute.xlu0 %660 }
 0x6c1   : > { %664 = vst.msk [vmem:[#allocation2] sm:$0xff] %vm663_vm5, %v661_v50  ;;  %v736_v51 = vpop.permute.xlu1 %735 }
 0x6c2   : > { %739 = vst.msk [vmem:[#allocation2] sm:$0xff] %vm738_vm6, %v736_v51 }
 0x6d0   : > { %v811_v52 = vpop.permute.xlu1 %810 }
 0x6d1   : > { %814 = vst.msk [vmem:[#allocation2] sm:$0xff] %vm813_vm11, %v811_v52 }
 0x6d8   : > { %v815_v53 = vld [vmem:[#allocation2] sm:$0xff] }
 0x6d9   : > { %v816_v54 = vpack.c.bf16 %v815_v53, %v815_v53 }
 0x6db   : > { %1046 = vmatmul.msk.bf16.vlgmr.msra.gmra.mxu0 %vm440_vm0, %v816_v54 }
 0x758   : > { %v839_v56 = vpop.f32.mrf.mxu0 }
 0x759   : > { %v840_v57 = vadd.f32 %v1110_v55, %v839_v56 }
 0x75b   : > { %v1447_v58 = vadd.f32 %v840_v57, %v1342_v0  ;;  %v880_v0 = vld [vmem:[%s1571_s9 + $0x18] sm:$0xff] }
 0x75c   : > { %v882_v4 = vpack.c.bf16 %v880_v0, %v879_v3 }
 0x75d   : > { %v846_v59 = vsel %vm440_vm0, %v1447_v58, 0.0 }
 0x75e   : > { %847 = vadd.xlane.f32.xlu2 %v846_v59  ;;  %896 = vmatpush.bf16.msra.mxu1 %v882_v4 }
 0x760   : > { %v841_v60 = vpop.f32.mrf.mxu0 }
 0x762   : > { %897 = vmatpush.bf16.msra.mxu1 %v881_v7 }
 0x7d1   : > { %v848_v61 = vpop.xlane.xlu2 %847 }
 0x7d2   : > { %v849_v62 = vmul.f32 %v848_v61, %v1346_v8 }
 0x7d4   : > { %v850_v63 = vsub.f32 %v1447_v58, %v849_v62 }
 0x7d6   : > { %v851_v1 = vmul.f32 %v850_v63, %v850_v63 }
 0x7d8   : > { %v852_v2 = vsel %vm440_vm0, %v851_v1, 0.0 }
 0x7d9   : > { %853 = vadd.xlane.f32.xlu0 %v852_v2 }
 0x84c   : > { %v854_v11 = vpop.xlane.xlu0 %853 }
 0x84d   : > { %v855_v14 = vmul.f32 %v854_v11, %v1346_v8 }
 0x84f   : > { %v856_v16 = vadd.f32 1e-05, %v855_v14 }
 0x851   : > { %1135 = vrsqrt.f32 %v856_v16  ;;  %vm863_vm13 = vweird.f32 %v856_v16 }
 0x857   : > { %v1136_v17 = vpop.eup %1135 }
 0x858   : > { %v858_v18 = vmul.f32 %v1136_v17, %v856_v16  ;;  %vm864_vm12 = vweird.f32 %v1136_v17 }
 0x859   : > { %vm865_vm14 = vmor %vm863_vm13, %vm864_vm12 }
 0x85a   : > { %v859_v19 = vmul.f32 %v1136_v17, %v858_v18 }
 0x85c   : > { %v860_v20 = vmul.f32 0.5, %v859_v19 }
 0x85e   : > { %v861_v21 = vsub.f32 1.5, %v860_v20 }
 0x860   : > { %v862_v22 = vmul.f32 %v1136_v17, %v861_v21 }
 0x862   : > { %v866_v24 = vsel %vm865_vm14, %v1136_v17, %v862_v22 }
 0x863   : > { %v867_v8 = vmul.f32 %v866_v24, %v850_v63  ;;  %v1114_v63 = vld [vmem:[%s1574_s12] ss:$0 sm:$0xff] }
 0x865   : > { %v871_v26 = vmul.f32 %v1111_v23, %v867_v8 }
 0x867   : > { %v875_v27 = vadd.f32 %v1112_v25, %v871_v26 }
 0x869   : > { %v876_v28 = vpack.c.bf16 %v875_v27, %v875_v27 }
 0x86b   : > { %1047 = vmatmul.msk.bf16.vlgmr.msra.gmra.mxu1 %vm440_vm0, %v876_v28 }
 0x8e8   : > { %v899_v49 = vpop.f32.mrf.mxu1 }
 0x8e9   : > { %v900_v50 = vadd.f32 %v1113_v48, %v899_v49 }
 0x8eb   : > { %v904_v51 = vmul.f32 0.044715, %v900_v50  ;;  %v903_v59 = vmul.f32 0.5, %v900_v50 }
 0x8ed   : > { %v905_v52 = vmul.f32 %v904_v51, %v900_v50 }
 0x8ef   : > { %v906_v53 = vmul.f32 %v905_v52, %v900_v50 }
 0x8f0   : > { %v901_v54 = vpop.f32.mrf.mxu1 }
 0x8f1   : > { %v907_v55 = vadd.f32 %v906_v53, %v900_v50 }
 0x8f3   : > { %v908_v56 = vmul.f32 0.7978846, %v907_v55 }
 0x8f5   : > { %1137 = vtanh.f32 %v908_v56 }
 0x8fb   : > { %v1138_v57 = vpop.eup %1137 }
 0x8fc   : > { %v910_v60 = vadd.f32 1.0, %v1138_v57 }
 0x8fe   : > { %v911_v61 = vmul.f32 %v910_v60, %v903_v59 }
 0x900   : > { %v912_v62 = vpack.c.bf16 %v911_v61, %v911_v61 }
 0x902   : > { %949 = vmatmul.bf16.vlgmr.msrb.gmra.mxu3 %v912_v62 }
 0x985   : > { %v950_v1 = vpop.f32.mrf.mxu3 }
 0x986   : > { %v951_v2 = vadd.f32 %v1114_v63, %v950_v1 }
 0x988   : > { %v954_v3 = vadd.f32 %v951_v2, %v1447_v58 }
 0x98a   : > { %955 = vst.msk [vmem:[%s431_s30] sm:$0xff] %vm440_vm0, %v954_v3 }
 0x98b   : > { %1166 = shalt.err (!%p1163_p3)
}
 0x98c   : > { %1052 = dma.vmem_to_hbm [thread:$0]  (%p1327_p5), %s970_s15, 128, %s972_s2, %s957_s29  }
 0x98d   : > { %v952_v58 = vpop.f32.mrf.mxu3 }
 0x98e PF: > { %p1058_p4 = scmp.ge.s32.totalorder %s1201_s28, 2  ;;  %s983_s1 = sand.u32 1, %s1189_s25  }
 0x98f   : > { %s984_s24 = scalar_lea.sflag [#allocation4], %s983_s1 }
 0x990   : > { %p1055_p7 = pnand %p1058_p4, %p1331_p6 }
 0x992   : > { %p1056_p8 = pneg %p1055_p7 }
 0x994   : > { %1184 = dma.done.wait (%p1056_p8), %s984_s24, 128  }
 0x995   : > { %1186 = vsyncadd (%p1056_p8), %s984_s24, 4294967168  ;;  %p23_p9 = scmp.ge.s32.totalorder %s1314_s14, 4   ;;  %s1586_s25 = smov %s1193_s26 }
 0x996   : > { %s1587_s26 = smov %s1197_s27  ;;  %s1588_s27 = smov %s1325_s17 }
 0x997   : > { %s1589_s28 = smov %s1314_s14  ;;  %25 = sbr.rel (!%p23_p9) target bundleno = 8 (0x8), region = 107 }
 0x99c   :  { %990 = vsyncpa [#allocation4], 1 }
 0x99d   :  { %992 = vsyncpa [#allocation4 + $0x1], 1 }

</bundles_post_ra>
